<compile_context>
chip_gen: v7x
topology: tpu7x:2x2x1
jax: 0.10.0
libtpu: 0.0.40
codegen_flags: <defaults>
</compile_context>

<pallas_src>
import jax
import jax.numpy as jnp
from jax.experimental import pallas as pl
from jax.experimental.pallas import tpu as pltpu

# Logical (PyTorch) dimensions.
BATCH, D_IN, D_HID, D_OUT = 1, 3, 4, 5

# Packed parameter slab layout (rows):
#   0..2 : W1  (3, 4)
#   3    : b1  (4,)
#   4..6 : W12 = (W1 @ W2)[:, :4]   (3, 4)
#   7    : b12 = (b1 @ W2 + b2)[:4] (4,)
SLAB_ROWS = 8


def mlp_gate_kernel(x_ref, w_ref, o_ref):
    """out = v1 * sigmoid(v2), with v1 = xW1+b1 and v2 = xW12+b12.

    x_ref: (1, 3) f32 in SMEM (scalar reads).
    w_ref: (8, 4) f32 packed slab in VMEM.
    o_ref: (1, 4) f32 in VMEM.
    """
    x0 = x_ref[0, 0]
    x1 = x_ref[0, 1]
    x2 = x_ref[0, 2]

    # VPU scalar-splat FMAs; each row slice is a (1, 4) masked vreg load.
    v1 = x0 * w_ref[0:1, :] + x1 * w_ref[1:2, :] + x2 * w_ref[2:3, :] + w_ref[3:4, :]
    v2 = x0 * w_ref[4:5, :] + x1 * w_ref[5:6, :] + x2 * w_ref[6:7, :] + w_ref[7:8, :]

    # lax.logistic lowers to the EUP (idle here) instead of a VPU f32 divide.
    o_ref[...] = v1 * jax.nn.sigmoid(v2)


def prepare_params(w1, b1, w2, b2):
    """Pack parameters ONCE (hoisted out of the per-call path).

    w1: (D_IN, D_HID), b1: (D_HID,), w2: (D_HID, D_OUT), b2: (D_OUT,).
    Returns a single (8, D_HID) f32 slab.  Pre-fusing W12/b12 reassociates the
    fc2 accumulation in f32 (within 1e-5 of the two-matmul reference).
    """
    w1 = w1.astype(jnp.float32)
    b1 = b1.astype(jnp.float32)
    w2 = w2.astype(jnp.float32)
    b2 = b2.astype(jnp.float32)

    w12 = (w1 @ w2)[:, :D_HID]        # (3, 4): only the gated columns survive
    b12 = (b1 @ w2 + b2)[:D_HID]      # (4,)

    slab = jnp.zeros((SLAB_ROWS, D_HID), jnp.float32)
    slab = slab.at[0:D_IN, :].set(w1)
    slab = slab.at[D_IN, :].set(b1)
    slab = slab.at[4:4 + D_IN, :].set(w12)
    slab = slab.at[4 + D_IN, :].set(b12)
    return slab


@jax.jit
def mlp_gate(x, slab):
    """x: (BATCH, D_IN) f32; slab: packed params from prepare_params()."""
    return pl.pallas_call(
        mlp_gate_kernel,
        out_shape=jax.ShapeDtypeStruct((BATCH, D_HID), jnp.float32),
        in_specs=[
            pl.BlockSpec(memory_space=pltpu.MemorySpace.SMEM),   # x scalars
            pl.BlockSpec(memory_space=pltpu.MemorySpace.VMEM),   # packed slab
        ],
        out_specs=pl.BlockSpec(memory_space=pltpu.MemorySpace.VMEM),
    )(x, slab)


def init_params(key):
    """Deterministic init mimicking torch.nn.Linear defaults: U(-1/sqrt(fan_in), ...)."""
    k1, k2, k3, k4 = jax.random.split(key, 4)
    bound1 = 1.0 / jnp.sqrt(float(D_IN))
    bound2 = 1.0 / jnp.sqrt(float(D_HID))
    w1 = jax.random.uniform(k1, (D_IN, D_HID), jnp.float32, -bound1, bound1)
    b1 = jax.random.uniform(k2, (D_HID,), jnp.float32, -bound1, bound1)
    w2 = jax.random.uniform(k3, (D_HID, D_OUT), jnp.float32, -bound2, bound2)
    b2 = jax.random.uniform(k4, (D_OUT,), jnp.float32, -bound2, bound2)
    return w1, b1, w2, b2


if __name__ == "__main__":
    key = jax.random.PRNGKey(0)
    kx, kp = jax.random.split(key)
    x1 = jax.random.normal(kx, (BATCH, D_IN), jnp.float32)
    w1, b1, w2, b2 = init_params(kp)

    slab = prepare_params(w1, b1, w2, b2)   # packed once, reused per call
    out = mlp_gate(x1, slab)
    out = jax.block_until_ready(out)

    # Pure-JAX reference (same fixed-up gating semantics, un-fused math).
    v1 = x1 @ w1 + b1
    v2 = v1 @ w2 + b2
    ref = v1 * jax.nn.sigmoid(v2)[:, :D_HID]
    assert out.shape == (BATCH, D_HID)
    assert jnp.allclose(out, ref, atol=1e-5, rtol=1e-5)

    print("KERNEL_OK")
</pallas_src>

<mosaic_0001>
module attributes {stable_mosaic.version = 11 : i64} {
  func.func @mlp_gate_kernel(%arg0: memref<1x3xf32, #tpu.memory_space<smem>>, %arg1: memref<8x4xf32, #tpu.memory_space<vmem>>, %arg2: memref<1x4xf32, #tpu.memory_space<vmem>>) attributes {dimension_semantics = [], scalar_prefetch = 0 : i64, scratch_operands = 0 : i64, tpu.core_type = #tpu.core_type<tc>} {
    %c0 = arith.constant 0 : index
    %c0_0 = arith.constant 0 : index
    %0 = memref.load %arg0[%c0, %c0_0] : memref<1x3xf32, #tpu.memory_space<smem>>
    %c0_1 = arith.constant 0 : index
    %c1 = arith.constant 1 : index
    %1 = memref.load %arg0[%c0_1, %c1] : memref<1x3xf32, #tpu.memory_space<smem>>
    %c0_2 = arith.constant 0 : index
    %c2 = arith.constant 2 : index
    %2 = memref.load %arg0[%c0_2, %c2] : memref<1x3xf32, #tpu.memory_space<smem>>
    %c0_3 = arith.constant 0 : index
    %c0_4 = arith.constant 0 : index
    %3 = vector.load %arg1[%c0_3, %c0_4] : memref<8x4xf32, #tpu.memory_space<vmem>>, vector<1x4xf32>
    %4 = vector.broadcast %0 : f32 to vector<1x4xf32>
    %5 = arith.mulf %4, %3 : vector<1x4xf32>
    %c1_5 = arith.constant 1 : index
    %c0_6 = arith.constant 0 : index
    %6 = vector.load %arg1[%c1_5, %c0_6] : memref<8x4xf32, #tpu.memory_space<vmem>>, vector<1x4xf32>
    %7 = vector.broadcast %1 : f32 to vector<1x4xf32>
    %8 = arith.mulf %7, %6 : vector<1x4xf32>
    %9 = arith.addf %5, %8 : vector<1x4xf32>
    %c2_7 = arith.constant 2 : index
    %c0_8 = arith.constant 0 : index
    %10 = vector.load %arg1[%c2_7, %c0_8] : memref<8x4xf32, #tpu.memory_space<vmem>>, vector<1x4xf32>
    %11 = vector.broadcast %2 : f32 to vector<1x4xf32>
    %12 = arith.mulf %11, %10 : vector<1x4xf32>
    %13 = arith.addf %9, %12 : vector<1x4xf32>
    %c3 = arith.constant 3 : index
    %c0_9 = arith.constant 0 : index
    %14 = vector.load %arg1[%c3, %c0_9] : memref<8x4xf32, #tpu.memory_space<vmem>>, vector<1x4xf32>
    %15 = arith.addf %13, %14 : vector<1x4xf32>
    %c4 = arith.constant 4 : index
    %c0_10 = arith.constant 0 : index
    %16 = vector.load %arg1[%c4, %c0_10] : memref<8x4xf32, #tpu.memory_space<vmem>>, vector<1x4xf32>
    %17 = vector.broadcast %0 : f32 to vector<1x4xf32>
    %18 = arith.mulf %17, %16 : vector<1x4xf32>
    %c5 = arith.constant 5 : index
    %c0_11 = arith.constant 0 : index
    %19 = vector.load %arg1[%c5, %c0_11] : memref<8x4xf32, #tpu.memory_space<vmem>>, vector<1x4xf32>
    %20 = vector.broadcast %1 : f32 to vector<1x4xf32>
    %21 = arith.mulf %20, %19 : vector<1x4xf32>
    %22 = arith.addf %18, %21 : vector<1x4xf32>
    %c6 = arith.constant 6 : index
    %c0_12 = arith.constant 0 : index
    %23 = vector.load %arg1[%c6, %c0_12] : memref<8x4xf32, #tpu.memory_space<vmem>>, vector<1x4xf32>
    %24 = vector.broadcast %2 : f32 to vector<1x4xf32>
    %25 = arith.mulf %24, %23 : vector<1x4xf32>
    %26 = arith.addf %22, %25 : vector<1x4xf32>
    %c7 = arith.constant 7 : index
    %c0_13 = arith.constant 0 : index
    %27 = vector.load %arg1[%c7, %c0_13] : memref<8x4xf32, #tpu.memory_space<vmem>>, vector<1x4xf32>
    %28 = arith.addf %26, %27 : vector<1x4xf32>
    %29 = arith.negf %28 : vector<1x4xf32>
    %30 = math.exp %29 : vector<1x4xf32>
    %cst = arith.constant 1.000000e+00 : f32
    %31 = vector.broadcast %cst : f32 to vector<1x4xf32>
    %32 = arith.addf %31, %30 : vector<1x4xf32>
    %33 = arith.divf %31, %32 : vector<1x4xf32>
    %34 = arith.mulf %15, %33 : vector<1x4xf32>
    %c0_14 = arith.constant 0 : index
    %c0_15 = arith.constant 0 : index
    %35 = vector.load %arg2[%c0_14, %c0_15] : memref<1x4xf32, #tpu.memory_space<vmem>>, vector<1x4xf32>
    tpu.vector_store %arg2[%c0_14, %c0_15], %34 {strides = array<i32>} : memref<1x4xf32, #tpu.memory_space<vmem>>, vector<1x4xf32>,
    return
  }
}

</mosaic_0001>

<bundles_post_ra>
// kernel: mlp_gate.1
= control target key start
LH: loop header
LB: loop body
LE: loop exit
PB: predicated region body
PF: predicated region fallthrough
CT: control target
= control target key end

     0   :  { %7 = vsyncpa [#allocation4], 0  ;;  %s178_s0 = inlined_call_operand.vmem [shape: f32[1,3], index: 0, kind: input, shape index: {}]   ;;  %s179_s1 = inlined_call_operand.vmem [shape: f32[8,4], index: 1, kind: input, shape index: {}]   ;;  %s180_s2 = inlined_call_operand.hbm [shape: f32[1,4], index: 2, kind: output, shape index: {}]  }
   0x1   :  { %8 = vsyncpa [#allocation3], 0  ;;  %s15_s11 = sshll.u32 %s178_s0, 4  ;;  %s16_s11 = int_to_ptr.vmem [resolvable:$true] %s15_s11 }
   0x2   :  { %s84_s12 = scalar_lea.vmem %s16_s11, 16  ;;  %p89_p1 = scmp.lt.s32.totalorder %s16_s11, %s16_s11 }
   0x3   :  { %p85_p0 = scmp.ne.s32.totalorder %s16_s11, %s84_s12  ;;  %p90_p2 = scmp.lt.s32.totalorder %s84_s12, %s84_s12 }
   0x5   :  { %p91_p3 = por %p90_p2, %p89_p1 }
   0x7   :  { %p92_p4 = pnand %p91_p3, %p85_p0 }
   0x9   :  { %95 = shalt.err (!%p92_p4)
}
   0xa   :  { %s122_s13 = smov [#allocation2]  }
   0xb   :  { %18 = dma.vmem_to_smem %s16_s11, 16, %s122_s13, [#allocation4]  }
   0xc   :  { %118 = dma.done.wait [#allocation4], 16  }
   0xd   :  { %119 = vsyncadd [#allocation4], 4294967280 }
   0xe   :  { %24 = sfence }
   0xf   :  { %s25_s14 = sld [smem:[#allocation2]]  ;;  %s75_s15 = sld [smem:[#allocation2 + $0x1]]  ;;  %v41_v0 = vld [vmem:[%s179_s1 + $0x4] sm:$0x1]  ;;  %v43_v1 = vld [vmem:[%s179_s1 + $0x5] sm:$0x1] }
  0x10   :  { %s76_s16 = sld [smem:[#allocation2 + $0x2]]  ;;  %v46_v2 = vld [vmem:[%s179_s1 + $0x6] sm:$0x1]  ;;  %v49_v10 = vld [vmem:[%s179_s1 + $0x7] sm:$0x1]  ;;  %s123_s4 = smov [#allocation5]  }
  0x11   :  { %v28_v14 = vld [vmem:[%s179_s1] sm:$0x1]  ;;  %v31_v15 = vld [vmem:[%s179_s1 + $0x1] sm:$0x1]  ;;  %v35_v18 = vld [vmem:[%s179_s1 + $0x2] sm:$0x1] }
  0x12   :  { %v39_v24 = vld [vmem:[%s179_s1 + $0x3] sm:$0x1]  ;;  %s66_s5 = sshll.u32 %s123_s4, 4  ;;  %vm58_vm0 = vcmask 24576   ;;  %s67_s5 = int_to_ptr.vmem [resolvable:$true] %s66_s5 }
  0x13   :  { %s96_s6 = scalar_lea.vmem %s67_s5, 16  ;;  %s100_s7 = scalar_lea.vmem %s67_s5, 32 }
  0x14   :  { %p97_p5 = scmp.ne.s32.totalorder %s67_s5, %s96_s6  ;;  %p101_p6 = scmp.lt.s32.totalorder %s67_s5, %s67_s5 }
  0x15   :  { %v29_v3 = vstv %s25_s14  ;;  %v32_v4 = vstv %s75_s15  ;;  %p102_p7 = scmp.lt.s32.totalorder %s100_s7, %s96_s6 }
  0x16   :  { %v36_v5 = vstv %s76_s16  ;;  %v42_v6 = vmul.f32 %v41_v0, %v29_v3  ;;  %v44_v7 = vmul.f32 %v43_v1, %v32_v4  ;;  %v30_v16 = vmul.f32 %v29_v3, %v28_v14 }
  0x17   :  { %v47_v8 = vmul.f32 %v46_v2, %v36_v5  ;;  %v33_v17 = vmul.f32 %v32_v4, %v31_v15  ;;  %v37_v22 = vmul.f32 %v36_v5, %v35_v18  ;;  %p103_p8 = por %p102_p7, %p101_p6 }
  0x18   :  { %v45_v9 = vadd.f32 %v44_v7, %v42_v6 }
  0x19   :  { %v34_v21 = vadd.f32 %v33_v17, %v30_v16  ;;  %p104_p9 = pnand %p103_p8, %p97_p5 }
  0x1a   :  { %v48_v11 = vadd.f32 %v47_v8, %v45_v9 }
  0x1b   :  { %v38_v23 = vadd.f32 %v37_v22, %v34_v21 }
  0x1c   :  { %v50_v12 = vadd.f32 %v49_v10, %v48_v11 }
  0x1d   :  { %v40_v25 = vadd.f32 %v39_v24, %v38_v23 }
  0x1e   :  { %v77_v13 = vmul.f32 -1.442695, %v50_v12 }
  0x20   :  { %80 = vpow2.f32 %v77_v13 }
  0x2a   :  { %v81_v19 = vpop.eup %80 }
  0x2b   :  { %v54_v20 = vadd.f32 1.0, %v81_v19 }
  0x2d   :  { %82 = vrcp.f32 %v54_v20 }
  0x37   :  { %v83_v26 = vpop.eup %82 }
  0x38   :  { %v57_v27 = vmul.f32 %v83_v26, %v40_v25 }
  0x3a   :  { %59 = vst.msk [vmem:[#allocation5] sm:$0x1] %vm58_vm0, %v57_v27 }
  0x3b   :  { %107 = shalt.err (!%p104_p9)
}
  0x3c   :  { %s108_s1 = scalar_lea.hbm %s180_s2, 16 }
  0x3d   :  { %p109_p10 = scmp.ne.s32.totalorder %s180_s2, %s108_s1  ;;  %p112_p11 = scmp.lt.u32.totalorder %s108_s1, %s180_s2 }
  0x3f   :  { %p114_p12 = pnand %p112_p11, %p109_p10 }
  0x41   :  { %117 = shalt.err (!%p114_p12)
}
  0x42   :  { %69 = dma.vmem_to_hbm [thread:$0]  %s67_s5, 16, %s180_s2, [#allocation3]  }
  0x43   :  { %120 = dma.done.wait [#allocation3], 16  }
  0x44   :  { %121 = vsyncadd [#allocation3], 4294967280 }
  0x45   :  { %73 = vsyncpa [#allocation3], 1 }
  0x46   :  { %74 = vsyncpa [#allocation4], 1 }

</bundles_post_ra>
